<compile_context>
chip_gen: v7x
topology: tpu7x:2x2x1
jax: 0.10.0
libtpu: 0.0.40
codegen_flags: <defaults>
</compile_context>

<pallas_src>
import math

import jax
import jax.numpy as jnp
from jax import lax
from jax.experimental import pallas as pl
from jax.experimental.pallas import tpu as pltpu

N_SHAPE = 40       # latent dim (n_shape in the PyTorch module)
N_CLASSES = 10     # Linear(n_shape, 10)
LANES = 128        # TPU lane width
LV_OFF = 64        # column offset of logvar inside the fused encoder output


def _round_up(v, m):
    return (v + m - 1) // m * m


def _reduction_tiling(D):
    """Return (Dp, tk): padded reduction length and k-tile size."""
    Dp = _round_up(D, LANES)
    if Dp <= 4096:
        return Dp, Dp          # whole reduction in one resident tile, nk == 1
    tk = 2048
    return _round_up(D, tk), tk


def _batch_tiling(B):
    """Return (bm, Bp): batch tile and padded batch."""
    if B < 32:
        return B, B            # full-dim block is always legal; no padding pre-pass
    if B <= 512:
        half = B // 2
        if B % 2 == 0 and half % 16 == 0:
            return half, B     # two tiles -> both TensorCores on v7x, still no padding
        return B, B
    bm = 256
    return bm, _round_up(B, bm)


def _classifier_kernel(x_ref, wenc_ref, benc_ref, eps_ref, wc_ref, bc_ref, out_ref):
    k = pl.program_id(1)

    @pl.when(k == 0)
    def _():
        out_ref[...] = jnp.zeros_like(out_ref)

    # Fused encoder projection: (bm, tk) bf16 @ (tk, 128) bf16 -> f32, accumulated directly
    # in the resident output block (no scratch accumulator).
    out_ref[...] += jnp.dot(x_ref[...].astype(jnp.bfloat16), wenc_ref[...],
                            preferred_element_type=jnp.float32)

    @pl.when(k == pl.num_programs(1) - 1)
    def _():
        # enc columns: [0:40]=mu, [40:64]=0, [64:104]=logvar, [104:128]=0
        enc = out_ref[...] + benc_ref[...]

        col = lax.broadcasted_iota(jnp.int32, (1, LANES), 1)
        lv_mask = ((col >= LV_OFF) & (col < LV_OFF + N_SHAPE)).astype(jnp.float32)
        mu_mask = (col < N_SHAPE).astype(jnp.float32)

        # std = exp(0.5*logvar) on the logvar lanes, exp(0)=1 elsewhere (eps is 0 there).
        std = jnp.exp(enc * (0.5 * lv_mask))

        # z lanes: [0:40] = mu, [64:104] = eps*std, rest 0.  The padded classifier weight
        # carries w_c in BOTH row bands, so z @ W_c == (mu + eps*std) @ w_c with no roll.
        z = enc * mu_mask + eps_ref[...] * std

        out_ref[...] = jnp.dot(z, wc_ref[...],
                               preferred_element_type=jnp.float32) + bc_ref[...]


def pack_params(params):
    """Fuse mu/logvar projections, pad lane-dense and to the kernel's reduction tiling.

    Done ONCE (not per forward call): no per-call weight pre-pass over HBM.
    """
    w_mu, b_mu, w_lv, b_lv, w_c, b_c = params
    D = w_mu.shape[0]
    Dp, _ = _reduction_tiling(D)

    w_enc = jnp.zeros((Dp, LANES), jnp.float32)
    w_enc = w_enc.at[:D, :N_SHAPE].set(w_mu)
    w_enc = w_enc.at[:D, LV_OFF:LV_OFF + N_SHAPE].set(w_lv)

    b_enc = jnp.zeros((1, LANES), jnp.float32)
    b_enc = b_enc.at[:, :N_SHAPE].set(b_mu)
    b_enc = b_enc.at[:, LV_OFF:LV_OFF + N_SHAPE].set(b_lv)

    # Classifier weight duplicated into the mu rows AND the (eps*std) rows; zero elsewhere,
    # so padding/logvar lanes of z contribute nothing.  Kept f32 (tiny, epilogue-only).
    w_c_pad = jnp.zeros((LANES, LANES), jnp.float32)
    w_c_pad = w_c_pad.at[:N_SHAPE, :N_CLASSES].set(w_c)
    w_c_pad = w_c_pad.at[LV_OFF:LV_OFF + N_SHAPE, :N_CLASSES].set(w_c)

    b_c_pad = jnp.zeros((1, LANES), jnp.float32)
    b_c_pad = b_c_pad.at[:, :N_CLASSES].set(b_c)

    return (w_enc.astype(jnp.bfloat16), b_enc, w_c_pad, b_c_pad)


def classifier_no_v_forward(x_nchw, packed, eps):
    B = x_nchw.shape[0]
    x_flat = x_nchw.reshape(B, -1)          # torch: x.view(x.shape[0], -1)
    D = x_flat.shape[1]

    w_enc, b_enc, w_c, b_c = packed
    Dp, tk = _reduction_tiling(D)
    assert w_enc.shape[0] == Dp, "packed weights do not match input feature dim"

    bm, Bp = _batch_tiling(B)
    nb, nk = Bp // bm, Dp // tk

    if (Bp != B) or (Dp != D):
        # TODO(synk): fallback pre-pass only when B/D are not tile-aligned; the common case
        # streams x straight from HBM with zero host-side copies.
        xp = jnp.zeros((Bp, Dp), x_flat.dtype).at[:B, :D].set(x_flat)
    else:
        xp = x_flat                          # no host pad, no host cast (cast in-kernel)

    # eps placed under the logvar lanes; zero elsewhere (tiny array, negligible traffic).
    ep = jnp.zeros((Bp, LANES), jnp.float32).at[:B, LV_OFF:LV_OFF + N_SHAPE].set(eps)

    cost = pl.CostEstimate(
        flops=2 * Bp * Dp * LANES + 2 * Bp * LANES * LANES,
        transcendentals=Bp * LANES,
        bytes_accessed=(xp.size * xp.dtype.itemsize          # x stream (dominant)
                        + w_enc.size * 2                     # bf16 fused encoder weight
                        + ep.size * 4 + w_c.size * 4
                        + b_enc.size * 4 + b_c.size * 4
                        + Bp * LANES * 4),                   # output writeback
    )

    out = pl.pallas_call(
        _classifier_kernel,
        out_shape=jax.ShapeDtypeStruct((Bp, LANES), jnp.float32),
        grid_spec=pltpu.PrefetchScalarGridSpec(
            num_scalar_prefetch=0,
            grid=(nb, nk),                                          # (batch, reduction)
            in_specs=[
                pl.BlockSpec((bm, tk), lambda b, k: (b, k)),        # x tile (f32/bf16)
                pl.BlockSpec((tk, LANES), lambda b, k: (k, 0)),     # fused encoder weights
                pl.BlockSpec((1, LANES), lambda b, k: (0, 0)),      # fused encoder bias
                pl.BlockSpec((bm, LANES), lambda b, k: (b, 0)),     # eps (lane-padded)
                pl.BlockSpec((LANES, LANES), lambda b, k: (0, 0)),  # padded W_c
                pl.BlockSpec((1, LANES), lambda b, k: (0, 0)),      # padded b_c
            ],
            out_specs=pl.BlockSpec((bm, LANES), lambda b, k: (b, 0)),
        ),
        compiler_params=pltpu.CompilerParams(
            dimension_semantics=("parallel", "arbitrary"),
            vmem_limit_bytes=48 * 1024 * 1024,   # safe on v7x (64 MiB phys), headroom on v5e/v6e
        ),
        cost_estimate=cost,
    )(xp, w_enc, b_enc, ep, w_c, b_c)

    return out[:B, :N_CLASSES]


def init_params(key, in_dim):
    """Deterministic init matching torch.nn.Linear default (U[-1/sqrt(fan_in), 1/sqrt(fan_in)])."""
    ks = jax.random.split(key, 6)

    def linear(kw, kb, fan_in, fan_out):
        bound = 1.0 / math.sqrt(fan_in)
        w = jax.random.uniform(kw, (fan_in, fan_out), jnp.float32, -bound, bound)
        b = jax.random.uniform(kb, (1, fan_out), jnp.float32, -bound, bound)
        return w, b

    w_mu, b_mu = linear(ks[0], ks[1], in_dim, N_SHAPE)
    w_lv, b_lv = linear(ks[2], ks[3], in_dim, N_SHAPE)
    w_c, b_c = linear(ks[4], ks[5], N_SHAPE, N_CLASSES)
    return (w_mu, b_mu, w_lv, b_lv, w_c, b_c)


if __name__ == "__main__":
    key = jax.random.PRNGKey(0)
    k_x, k_p, k_eps, _ = jax.random.split(key, 4)

    # small NCHW input consistent with the flatten-then-encode forward
    B, C, H, W = 2, 4, 16, 16
    x = jax.random.normal(k_x, (B, C, H, W), dtype=jnp.float32)

    params = init_params(k_p, C * H * W)
    packed = pack_params(params)
    eps = jax.random.normal(k_eps, (B, N_SHAPE), dtype=jnp.float32)  # reparameterize noise

    out = classifier_no_v_forward(x, packed, eps)
    jax.block_until_ready(out)

    assert out.shape == (B, N_CLASSES) and out.dtype == jnp.float32

    # pure-JAX reference (with the same bf16 rounding of x / encoder weights the kernel uses)
    w_mu, b_mu, w_lv, b_lv, w_c, b_c = params
    bf = lambda a: a.astype(jnp.bfloat16).astype(jnp.float32)
    xf = bf(x.reshape(B, -1))
    mu = xf @ bf(w_mu) + b_mu
    logvar = xf @ bf(w_lv) + b_lv
    z = mu + eps * jnp.exp(0.5 * logvar)
    ref = z @ w_c + b_c
    assert jnp.allclose(out, ref, atol=2e-2, rtol=2e-2)

    print("KERNEL_OK")
</pallas_src>

<mosaic_0001>
module attributes {stable_mosaic.version = 11 : i64} {
  func.func @_classifier_kernel(%arg0: i32, %arg1: i32, %arg2: memref<2x1024xf32, #tpu.memory_space<vmem>>, %arg3: memref<1024x128xbf16, #tpu.memory_space<vmem>>, %arg4: memref<1x128xf32, #tpu.memory_space<vmem>>, %arg5: memref<2x128xf32, #tpu.memory_space<vmem>>, %arg6: memref<128x128xf32, #tpu.memory_space<vmem>>, %arg7: memref<1x128xf32, #tpu.memory_space<vmem>>, %arg8: memref<2x128xf32, #tpu.memory_space<vmem>>) attributes {dimension_semantics = [#tpu.dimension_semantics<parallel>, #tpu.dimension_semantics<arbitrary>], iteration_bounds = array<i64: 1, 1>, scalar_prefetch = 0 : i64, scratch_operands = 0 : i64, tpu.core_type = #tpu.core_type<tc>, window_params = [{transform_indices = @transform_0, window_bounds = array<i64: 2, 1024>}, {transform_indices = @transform_1, window_bounds = array<i64: 1024, 128>}, {pipeline_mode = #tpu.pipeline_mode<synchronous>, transform_indices = @transform_2, window_bounds = array<i64: 1, 128>}, {transform_indices = @transform_3, window_bounds = array<i64: 2, 128>}, {pipeline_mode = #tpu.pipeline_mode<synchronous>, transform_indices = @transform_4, window_bounds = array<i64: 128, 128>}, {pipeline_mode = #tpu.pipeline_mode<synchronous>, transform_indices = @transform_5, window_bounds = array<i64: 1, 128>}, {transform_indices = @transform_6, window_bounds = array<i64: 2, 128>}]} {
    %c0_i32 = arith.constant 0 : i32
    %0 = arith.cmpi eq, %arg1, %c0_i32 : i32
    %1 = arith.extui %0 : i1 to i32
    %c0_i32_0 = arith.constant 0 : i32
    %2 = arith.cmpi ne, %1, %c0_i32_0 : i32
    scf.if %2 {
      %cst_10 = arith.constant 0.000000e+00 : f32
      %13 = vector.broadcast %cst_10 : f32 to vector<2x128xf32>
      %c0_11 = arith.constant 0 : index
      %c0_12 = arith.constant 0 : index
      %14 = vector.load %arg8[%c0_11, %c0_12] : memref<2x128xf32, #tpu.memory_space<vmem>>, vector<2x128xf32>
      tpu.vector_store %arg8[%c0_11, %c0_12], %13 {strides = array<i32>} : memref<2x128xf32, #tpu.memory_space<vmem>>, vector<2x128xf32>,
    } else {
    }
    %c0 = arith.constant 0 : index
    %c0_1 = arith.constant 0 : index
    %3 = vector.load %arg8[%c0, %c0_1] : memref<2x128xf32, #tpu.memory_space<vmem>>, vector<2x128xf32>
    %c0_2 = arith.constant 0 : index
    %c0_3 = arith.constant 0 : index
    %4 = vector.load %arg2[%c0_2, %c0_3] : memref<2x1024xf32, #tpu.memory_space<vmem>>, vector<2x1024xf32>
    %5 = arith.truncf %4 : vector<2x1024xf32> to vector<2x1024xbf16>
    %c0_4 = arith.constant 0 : index
    %c0_5 = arith.constant 0 : index
    %6 = vector.load %arg3[%c0_4, %c0_5] : memref<1024x128xbf16, #tpu.memory_space<vmem>>, vector<1024x128xbf16>
    %cst = arith.constant dense<0.000000e+00> : vector<2x128xf32>
    %7 = tpu.matmul %5, %6, %cst {dimension_numbers = #tpu.dot_dimension_numbers<[1], [0], [0], [1], [0, 0, 1, 1], [], []>} : vector<2x1024xbf16>, vector<1024x128xbf16>, vector<2x128xf32> -> vector<2x128xf32>
    %8 = arith.addf %3, %7 : vector<2x128xf32>
    %c0_6 = arith.constant 0 : index
    %c0_7 = arith.constant 0 : index
    %9 = vector.load %arg8[%c0_6, %c0_7] : memref<2x128xf32, #tpu.memory_space<vmem>>, vector<2x128xf32>
    tpu.vector_store %arg8[%c0_6, %c0_7], %8 {strides = array<i32>} : memref<2x128xf32, #tpu.memory_space<vmem>>, vector<2x128xf32>,
    %c0_i32_8 = arith.constant 0 : i32
    %10 = arith.cmpi eq, %arg1, %c0_i32_8 : i32
    %11 = arith.extui %10 : i1 to i32
    %c0_i32_9 = arith.constant 0 : i32
    %12 = arith.cmpi ne, %11, %c0_i32_9 : i32
    scf.if %12 {
      %c0_10 = arith.constant 0 : index
      %c0_11 = arith.constant 0 : index
      %13 = vector.load %arg8[%c0_10, %c0_11] : memref<2x128xf32, #tpu.memory_space<vmem>>, vector<2x128xf32>
      %c0_12 = arith.constant 0 : index
      %c0_13 = arith.constant 0 : index
      %14 = vector.load %arg4[%c0_12, %c0_13] : memref<1x128xf32, #tpu.memory_space<vmem>>, vector<1x128xf32>
      %15 = vector.broadcast %14 : vector<1x128xf32> to vector<2x128xf32>
      %16 = arith.addf %13, %15 : vector<2x128xf32>
      %17 = tpu.iota {dimensions = array<i32: 1>} : vector<1x128xi32>
      %c64_i32 = arith.constant 64 : i32
      %18 = vector.broadcast %c64_i32 : i32 to vector<1x128xi32>
      %19 = arith.cmpi sge, %17, %18 : vector<1x128xi32>
      %c104_i32 = arith.constant 104 : i32
      %20 = vector.broadcast %c104_i32 : i32 to vector<1x128xi32>
      %21 = arith.cmpi slt, %17, %20 : vector<1x128xi32>
      %22 = arith.andi %19, %21 : vector<1x128xi1>
      %23 = arith.extui %22 : vector<1x128xi1> to vector<1x128xi32>
      %24 = arith.sitofp %23 : vector<1x128xi32> to vector<1x128xf32>
      %c40_i32 = arith.constant 40 : i32
      %25 = vector.broadcast %c40_i32 : i32 to vector<1x128xi32>
      %26 = arith.cmpi slt, %17, %25 : vector<1x128xi32>
      %27 = arith.extui %26 : vector<1x128xi1> to vector<1x128xi32>
      %28 = arith.sitofp %27 : vector<1x128xi32> to vector<1x128xf32>
      %cst_14 = arith.constant 5.000000e-01 : f32
      %29 = vector.broadcast %cst_14 : f32 to vector<1x128xf32>
      %30 = arith.mulf %29, %24 : vector<1x128xf32>
      %31 = vector.broadcast %30 : vector<1x128xf32> to vector<2x128xf32>
      %32 = arith.mulf %16, %31 : vector<2x128xf32>
      %33 = math.exp %32 : vector<2x128xf32>
      %34 = vector.broadcast %28 : vector<1x128xf32> to vector<2x128xf32>
      %35 = arith.mulf %16, %34 : vector<2x128xf32>
      %c0_15 = arith.constant 0 : index
      %c0_16 = arith.constant 0 : index
      %36 = vector.load %arg5[%c0_15, %c0_16] : memref<2x128xf32, #tpu.memory_space<vmem>>, vector<2x128xf32>
      %37 = arith.mulf %36, %33 : vector<2x128xf32>
      %38 = arith.addf %35, %37 : vector<2x128xf32>
      %c0_17 = arith.constant 0 : index
      %c0_18 = arith.constant 0 : index
      %39 = vector.load %arg6[%c0_17, %c0_18] : memref<128x128xf32, #tpu.memory_space<vmem>>, vector<128x128xf32>
      %cst_19 = arith.constant dense<0.000000e+00> : vector<2x128xf32>
      %40 = tpu.matmul %38, %39, %cst_19 {dimension_numbers = #tpu.dot_dimension_numbers<[1], [0], [0], [1], [0, 0, 1, 1], [], []>} : vector<2x128xf32>, vector<128x128xf32>, vector<2x128xf32> -> vector<2x128xf32>
      %c0_20 = arith.constant 0 : index
      %c0_21 = arith.constant 0 : index
      %41 = vector.load %arg7[%c0_20, %c0_21] : memref<1x128xf32, #tpu.memory_space<vmem>>, vector<1x128xf32>
      %42 = vector.broadcast %41 : vector<1x128xf32> to vector<2x128xf32>
      %43 = arith.addf %40, %42 : vector<2x128xf32>
      %c0_22 = arith.constant 0 : index
      %c0_23 = arith.constant 0 : index
      %44 = vector.load %arg8[%c0_22, %c0_23] : memref<2x128xf32, #tpu.memory_space<vmem>>, vector<2x128xf32>
      tpu.vector_store %arg8[%c0_22, %c0_23], %43 {strides = array<i32>} : memref<2x128xf32, #tpu.memory_space<vmem>>, vector<2x128xf32>,
    } else {
    }
    return
  }
  func.func @transform_0(%arg0: i32, %arg1: i32) -> (i32, i32) {
    %c0_i32 = arith.constant 0 : i32
    return %arg0, %arg1 : i32, i32
  }
  func.func @transform_1(%arg0: i32, %arg1: i32) -> (i32, i32) {
    %c0_i32 = arith.constant 0 : i32
    %c0_i32_0 = arith.constant 0 : i32
    return %arg1, %c0_i32 : i32, i32
  }
  func.func @transform_2(%arg0: i32, %arg1: i32) -> (i32, i32) {
    %c0_i32 = arith.constant 0 : i32
    %c0_i32_0 = arith.constant 0 : i32
    %c0_i32_1 = arith.constant 0 : i32
    return %c0_i32, %c0_i32_0 : i32, i32
  }
  func.func @transform_3(%arg0: i32, %arg1: i32) -> (i32, i32) {
    %c0_i32 = arith.constant 0 : i32
    %c0_i32_0 = arith.constant 0 : i32
    return %arg0, %c0_i32 : i32, i32
  }
  func.func @transform_4(%arg0: i32, %arg1: i32) -> (i32, i32) {
    %c0_i32 = arith.constant 0 : i32
    %c0_i32_0 = arith.constant 0 : i32
    %c0_i32_1 = arith.constant 0 : i32
    return %c0_i32, %c0_i32_0 : i32, i32
  }
  func.func @transform_5(%arg0: i32, %arg1: i32) -> (i32, i32) {
    %c0_i32 = arith.constant 0 : i32
    %c0_i32_0 = arith.constant 0 : i32
    %c0_i32_1 = arith.constant 0 : i32
    return %c0_i32, %c0_i32_0 : i32, i32
  }
  func.func @transform_6(%arg0: i32, %arg1: i32) -> (i32, i32) {
    %c0_i32 = arith.constant 0 : i32
    %c0_i32_0 = arith.constant 0 : i32
    return %arg0, %c0_i32 : i32, i32
  }
}

</mosaic_0001>

<bundles_post_ra>
// kernel: tpu_custom_call.1
= control target key start
LH: loop header
LB: loop body
LE: loop exit
PB: predicated region body
PF: predicated region fallthrough
CT: control target
= control target key end

     0   :  { %11 = vsyncpa [#allocation3], 0  ;;  %s1460_s0 = inlined_call_operand.hbm [shape: f32[2,1024], index: 0, kind: input, shape index: {}]   ;;  %s1461_s1 = inlined_call_operand.hbm [shape: bf16[1024,128], index: 1, kind: input, shape index: {}]   ;;  %s1462_s2 = inlined_call_operand.vmem [shape: f32[1,128], index: 2, kind: input, shape index: {}]   ;;  %s1463_s3 = inlined_call_operand.vmem [shape: f32[2,128], index: 3, kind: input, shape index: {}]   ;;  %s1464_s4 = inlined_call_operand.hbm [shape: f32[128,128], index: 4, kind: input, shape index: {}]   ;;  %s1465_s5 = inlined_call_operand.vmem [shape: f32[1,128], index: 5, kind: input, shape index: {}]   ;;  %s1466_s6 = inlined_call_operand.hbm [shape: f32[2,128], index: 6, kind: output, shape index: {}]  }
   0x1   :  { %12 = vsyncpa [#allocation6], 0 }
   0x2   :  { %13 = vsyncpa [#allocation4], 0  ;;  %s1344_s21 = smov [#allocation5]   ;;  %s1250_s25 = scalar_lea.hbm %s1461_s1, 8192 }
   0x3   :  { %s29_s22 = sshll.u32 %s1344_s21, 4  ;;  %p1251_p0 = scmp.ne.s32.totalorder %s1461_s1, %s1250_s25  ;;  %s30_s22 = int_to_ptr.vmem [resolvable:$true] %s29_s22 }
   0x4   :  { %p1254_p1 = scmp.lt.u32.totalorder %s1250_s25, %s1461_s1 }
   0x6   :  { %p1256_p2 = pnand %p1254_p1, %p1251_p0 }
   0x8   :  { %1259 = shalt.err (!%p1256_p2)
}
   0x9   :  { %s1260_s30 = scalar_lea.vmem %s30_s22, 8192  ;;  %p1265_p4 = scmp.lt.s32.totalorder %s30_s22, %s30_s22 }
   0xa   :  { %p1261_p3 = scmp.ne.s32.totalorder %s30_s22, %s1260_s30  ;;  %p1266_p5 = scmp.lt.s32.totalorder %s1260_s30, %s1260_s30 }
   0xc   :  { %p1267_p6 = por %p1266_p5, %p1265_p4 }
   0xe   :  { %p1268_p7 = pnand %p1267_p6, %p1261_p3 }
  0x10   :  { %1271 = shalt.err (!%p1268_p7)
}
  0x11   :  { %s1345_s7 = smov 64   ;;  %s1346_s8 = smov 4  }
  0x12   :  { %35 = dma.hbm_to_vmem [thread:$0]  %s1461_s1, 8192, %s30_s22, [#allocation6], %s1345_s7, %s1345_s7, %s1346_s8  }
  0x13   :  { %s1347_s11 = smov [#allocation2]   ;;  %s1348_s13 = smov [#allocation7]  }
  0x14   :  { %s20_s12 = sshll.u32 %s1347_s11, 4  ;;  %s45_s14 = sshll.u32 %s1348_s13, 4  ;;  %s21_s12 = int_to_ptr.vmem [resolvable:$true] %s20_s12  ;;  %s46_s14 = int_to_ptr.vmem [resolvable:$true] %s45_s14 }
  0x15   :  { %s1272_s17 = scalar_lea.hbm %s1460_s0, 256 }
  0x16   :  { %p1273_p8 = scmp.ne.s32.totalorder %s1460_s0, %s1272_s17  ;;  %p1276_p9 = scmp.lt.u32.totalorder %s1272_s17, %s1460_s0 }
  0x18   :  { %p1278_p10 = pnand %p1276_p9, %p1273_p8 }
  0x1a   :  { %1281 = shalt.err (!%p1278_p10)
}
  0x1b   :  { %s1282_s1 = scalar_lea.vmem %s21_s12, 256  ;;  %p1287_p12 = scmp.lt.s32.totalorder %s21_s12, %s21_s12 }
  0x1c   :  { %p1283_p11 = scmp.ne.s32.totalorder %s21_s12, %s1282_s1  ;;  %p1288_p13 = scmp.lt.s32.totalorder %s1282_s1, %s1282_s1 }
  0x1e   :  { %p1289_p0 = por %p1288_p13, %p1287_p12 }
  0x20   :  { %p1290_p1 = pnand %p1289_p0, %p1283_p11 }
  0x22   :  { %1293 = shalt.err (!%p1290_p1)
}
  0x23   :  { %23 = dma.hbm_to_vmem [thread:$0]  %s1460_s0, 256, %s21_s12, [#allocation3]  }
  0x24   :  { %s1294_s26 = scalar_lea.hbm %s1464_s4, 2048 }
  0x25   :  { %p1295_p2 = scmp.ne.s32.totalorder %s1464_s4, %s1294_s26  ;;  %p1298_p3 = scmp.lt.u32.totalorder %s1294_s26, %s1464_s4 }
  0x27   :  { %p1300_p4 = pnand %p1298_p3, %p1295_p2 }
  0x29   :  { %1303 = shalt.err (!%p1300_p4)
}
  0x2a   :  { %s1304_s7 = scalar_lea.vmem %s46_s14, 2048  ;;  %p1309_p6 = scmp.lt.s32.totalorder %s46_s14, %s46_s14 }
  0x2b   :  { %p1305_p5 = scmp.ne.s32.totalorder %s46_s14, %s1304_s7  ;;  %p1310_p7 = scmp.lt.s32.totalorder %s1304_s7, %s1304_s7 }
  0x2d   :  { %p1311_p8 = por %p1310_p7, %p1309_p6 }
  0x2f   :  { %p1312_p9 = pnand %p1311_p8, %p1305_p5 }
  0x31   :  { %1315 = shalt.err (!%p1312_p9)
}
  0x32   :  { %s1349_s0 = smov 128   ;;  %s1350_s8 = smov 8  }
  0x33   :  { %51 = dma.hbm_to_vmem [thread:$0]  %s1464_s4, 2048, %s46_s14, [#allocation6], %s1349_s0, %s1349_s0, %s1350_s8  }
  0x34   :  { %1338 = dma.done.wait [#allocation3], 256  }
  0x35   :  { %1339 = vsyncadd [#allocation3], 4294967040 }
  0x36   :  { %1340 = dma.done.wait [#allocation6], 10240  }
  0x37   :  { %1341 = vsyncadd [#allocation6], 4294957056  ;;  %v1182_v0 = vld [vmem:[#allocation5 + $0x40] sm:$0xff]   ;;  %v1186_v4 = vld [vmem:[#allocation5 + $0x48] sm:$0xff]   ;;  %v1351_v22 = vmov 1983009808   ;;  %v78_v24 = vlaneseq }
  0x38   :  { %v1183_v1 = vld [vmem:[#allocation5 + $0xc0] sm:$0xff]   ;;  %1006 = vmatprep.subr.bf16.mxu0 %v1182_v0  ;;  %v1187_v5 = vld [vmem:[#allocation5 + $0xc8] sm:$0xff]   ;;  %v1190_v8 = vld [vmem:[#allocation5 + $0x50] sm:$0xff]   ;;  %v76_v23 = vunpack.c.l.s4 %v1351_v22  ;;  %vm1354_vm0 = vmmov 0   ;;  %s1355_s15 = smov [#allocation8]  }
  0x39   :  { %v1184_v2 = vld [vmem:[#allocation5] sm:$0xff]   ;;  %1028 = vmatprep.subr.bf16.mxu1 %v1183_v1  ;;  %v1188_v6 = vld [vmem:[#allocation5 + $0x8] sm:$0xff]   ;;  %v1191_v9 = vld [vmem:[#allocation5 + $0xd0] sm:$0xff]   ;;  %v79_v30 = vshrl.u32 %v78_v24, 7  ;;  %s928_s16 = sshll.u32 %s1355_s15, 4  ;;  %s929_s16 = int_to_ptr.vmem [resolvable:$true] %s928_s16 }
  0x3a   :  { %v1185_v3 = vld [vmem:[#allocation5 + $0x80] sm:$0xff]   ;;  %1007 = vmatpush3.bf16.msra.mxu0 %v1184_v2  ;;  %v1189_v7 = vld [vmem:[#allocation5 + $0x88] sm:$0xff]   ;;  %v1192_v10 = vld [vmem:[#allocation5 + $0x10] sm:$0xff]   ;;  %v77_v29 = vunpack.c.0.s8 %v76_v23  ;;  %s1316_s17 = scalar_lea.vmem %s929_s16, 32  ;;  %p1321_p11 = scmp.lt.s32.totalorder %s929_s16, %s929_s16 }
  0x3b   :  { %1029 = vmatpush3.bf16.msra.mxu1 %v1185_v3  ;;  %1008 = vmatprep.subr.bf16.mxu0 %v1186_v4  ;;  %v1193_v11 = vld [vmem:[#allocation5 + $0x90] sm:$0xff]   ;;  %v1194_v12 = vld [vmem:[#allocation5 + $0x58] sm:$0xff]   ;;  %v1198_v16 = vld [vmem:[#allocation5 + $0x60] sm:$0xff]   ;;  %p1317_p10 = scmp.ne.s32.totalorder %s929_s16, %s1316_s17  ;;  %p1322_p12 = scmp.lt.s32.totalorder %s1316_s17, %s1316_s17 }
  0x3c   :  { %1030 = vmatprep.subr.bf16.mxu1 %v1187_v5  ;;  %v1195_v13 = vld [vmem:[#allocation5 + $0xd8] sm:$0xff]   ;;  %v1199_v17 = vld [vmem:[#allocation5 + $0xe0] sm:$0xff]   ;;  %v1202_v20 = vld [vmem:[#allocation5 + $0x68] sm:$0xff]   ;;  %v1428_v35 = vsub.s32 %v77_v29, %v79_v30 }
  0x3d   :  { %v1196_v14 = vld [vmem:[#allocation5 + $0x18] sm:$0xff]   ;;  %v1200_v18 = vld [vmem:[#allocation5 + $0x20] sm:$0xff]   ;;  %v1203_v21 = vld [vmem:[#allocation5 + $0xe8] sm:$0xff]   ;;  %p1323_p13 = por %p1322_p12, %p1321_p11 }
  0x3e   :  { %1009 = vmatpush3.bf16.msra.mxu0 %v1188_v6  ;;  %v1197_v15 = vld [vmem:[#allocation5 + $0x98] sm:$0xff]   ;;  %v1201_v19 = vld [vmem:[#allocation5 + $0xa0] sm:$0xff]   ;;  %v1204_v25 = vld [vmem:[#allocation5 + $0x28] sm:$0xff]  }
  0x3f   :  { %1031 = vmatpush3.bf16.msra.mxu1 %v1189_v7  ;;  %1010 = vmatprep.subr.bf16.mxu0 %v1190_v8  ;;  %v1205_v26 = vld [vmem:[#allocation5 + $0xa8] sm:$0xff]   ;;  %v1206_v27 = vld [vmem:[#allocation5 + $0x70] sm:$0xff]   ;;  %v1210_v33 = vld [vmem:[#allocation5 + $0x78] sm:$0xff]   ;;  %p1324_p0 = pnand %p1323_p13, %p1317_p10 }
  0x40   :  { %1032 = vmatprep.subr.bf16.mxu1 %v1191_v9  ;;  %v1207_v28 = vld [vmem:[#allocation5 + $0xf0] sm:$0xff]   ;;  %v1211_v34 = vld [vmem:[#allocation5 + $0xf8] sm:$0xff]   ;;  %v1215_v41 = vld [vmem:[#allocation5 + $0x140] sm:$0xff]  }
  0x41   :  { %v1208_v31 = vld [vmem:[#allocation5 + $0x30] sm:$0xff]   ;;  %v1212_v36 = vld [vmem:[#allocation5 + $0x38] sm:$0xff]   ;;  %v1216_v42 = vld [vmem:[#allocation5 + $0x1c0] sm:$0xff]  }
  0x42   :  { %1011 = vmatpush3.bf16.msra.mxu0 %v1192_v10  ;;  %v1209_v32 = vld [vmem:[#allocation5 + $0xb0] sm:$0xff]   ;;  %v1213_v37 = vld [vmem:[#allocation5 + $0xb8] sm:$0xff]   ;;  %v1217_v48 = vld [vmem:[#allocation5 + $0x100] sm:$0xff]  }
  0x43   :  { %1033 = vmatpush3.bf16.msra.mxu1 %v1193_v11  ;;  %1012 = vmatprep.subr.bf16.mxu0 %v1194_v12  ;;  %v70_v38 = vld [vmem:[#allocation2] sm:$0xff]  ;;  %v1219_v50 = vld [vmem:[#allocation5 + $0x148] sm:$0xff]   ;;  %v1218_v52 = vld [vmem:[#allocation5 + $0x180] sm:$0xff]  }
  0x44   :  { %1034 = vmatprep.subr.bf16.mxu1 %v1195_v13  ;;  %v81_v39 = vrot.slane %v70_v38, %v1428_v35  ;;  %v74_v40 = vcombine.high %v70_v38, %v70_v38  ;;  %v1220_v53 = vld [vmem:[#allocation5 + $0x1c8] sm:$0xff]   ;;  %v1223_v55 = vld [vmem:[#allocation5 + $0x150] sm:$0xff]   ;;  %v1227_v59 = vld [vmem:[#allocation5 + $0x158] sm:$0xff]  }
  0x45   :  { %v1221_v54 = vld [vmem:[#allocation5 + $0x108] sm:$0xff]   ;;  %v1224_v57 = vld [vmem:[#allocation5 + $0x1d0] sm:$0xff]   ;;  %v1228_v61 = vld [vmem:[#allocation5 + $0x1d8] sm:$0xff]  }
  0x46   :  { %1013 = vmatpush3.bf16.msra.mxu0 %v1196_v14  ;;  %v89_v43 = vcombine.high %v81_v39, %v81_v39  ;;  %v88_v44 = vrot.slane %v74_v40, %v1428_v35  ;;  %v116_v45 = vpack.c.bf16 %v81_v39, %v81_v39  ;;  %v1222_v56 = vld [vmem:[#allocation5 + $0x188] sm:$0xff]   ;;  %v1225_v58 = vld [vmem:[#allocation5 + $0x110] sm:$0xff]   ;;  %v1229_v62 = vld [vmem:[#allocation5 + $0x118] sm:$0xff]  }
  0x47   :  { %1035 = vmatpush3.bf16.msra.mxu1 %v1197_v15  ;;  %1014 = vmatprep.subr.bf16.mxu0 %v1198_v16  ;;  %v1226_v60 = vld [vmem:[#allocation5 + $0x190] sm:$0xff]   ;;  %v1231_v63 = vld [vmem:[#allocation5 + $0x160] sm:$0xff]   ;;  %v1230_v0 = vld [vmem:[#allocation5 + $0x198] sm:$0xff]  }
  0x48   :  { %1036 = vmatprep.subr.bf16.mxu1 %v1199_v17  ;;  %v117_v46 = vpack.c.bf16 %v89_v43, %v89_v43  ;;  %v90_v47 = vcombine.high %v88_v44, %v88_v44  ;;  %v118_v49 = vpack.c.bf16 %v88_v44, %v88_v44  ;;  %v1232_v1 = vld [vmem:[#allocation5 + $0x1e0] sm:$0xff]   ;;  %v1235_v3 = vld [vmem:[#allocation5 + $0x168] sm:$0xff]   ;;  %v1239_v7 = vld [vmem:[#allocation5 + $0x170] sm:$0xff]  }
  0x49   :  { %v1233_v2 = vld [vmem:[#allocation5 + $0x120] sm:$0xff]   ;;  %v1236_v5 = vld [vmem:[#allocation5 + $0x1e8] sm:$0xff]   ;;  %v1240_v9 = vld [vmem:[#allocation5 + $0x1f0] sm:$0xff]  }
  0x4a   :  { %1015 = vmatpush3.bf16.msra.mxu0 %v1200_v18  ;;  %668 = vmatprep.mubr.bf16.mxu0 %v117_v46  ;;  %v119_v51 = vpack.c.bf16 %v90_v47, %v90_v47  ;;  %v1234_v4 = vld [vmem:[#allocation5 + $0x1a0] sm:$0xff]   ;;  %v1237_v6 = vld [vmem:[#allocation5 + $0x128] sm:$0xff]   ;;  %v1241_v10 = vld [vmem:[#allocation5 + $0x130] sm:$0xff]  }
  0x4b   :  { %1037 = vmatpush3.bf16.msra.mxu1 %v1201_v19  ;;  %1016 = vmatprep.subr.bf16.mxu0 %v1202_v20  ;;  %v1238_v8 = vld [vmem:[#allocation5 + $0x1a8] sm:$0xff]   ;;  %v1243_v11 = vld [vmem:[#allocation5 + $0x178] sm:$0xff]   ;;  %v1242_v12 = vld [vmem:[#allocation5 + $0x1b0] sm:$0xff]  }
  0x4c   :  { %1038 = vmatprep.subr.bf16.mxu1 %v1203_v21  ;;  %708 = vmatprep.mubr.bf16.mxu1 %v119_v51  ;;  %v1244_v13 = vld [vmem:[#allocation5 + $0x1f8] sm:$0xff]   ;;  %v829_v29 = vld [vmem:[#allocation7 + $0x8] sm:$0xff]  ;;  %v830_v30 = vld [vmem:[#allocation7 + $0x10] sm:$0xff] }
  0x4d   :  { %v71_v14 = vld [vmem:[#allocation2 + $0x8] sm:$0xff]  ;;  %v834_v38 = vld [vmem:[#allocation7 + $0x30] sm:$0xff]  ;;  %v840_v47 = vld [vmem:[#allocation7 + $0x60] sm:$0xff] }
  0x4e   :  { %1017 = vmatpush3.bf16.msra.mxu0 %v1204_v25  ;;  %v1245_v15 = vld [vmem:[#allocation5 + $0x138] sm:$0xff]   ;;  %v98_v16 = vrot.slane %v71_v14, %v1428_v35  ;;  %v91_v17 = vcombine.high %v71_v14, %v71_v14  ;;  %v838_v44 = vld [vmem:[#allocation7 + $0x50] sm:$0xff] }
  0x4f   :  { %1039 = vmatpush3.bf16.msra.mxu1 %v1205_v26  ;;  %1018 = vmatprep.subr.bf16.mxu0 %v1206_v27  ;;  %v1246_v18 = vld [vmem:[#allocation5 + $0x1b8] sm:$0xff]   ;;  %v1352_v27 = vmov 0.0  }
  0x50   :  { %1040 = vmatprep.subr.bf16.mxu1 %v1207_v28  ;;  %v106_v19 = vcombine.high %v98_v16, %v98_v16  ;;  %v105_v20 = vrot.slane %v91_v17, %v1428_v35  ;;  %v120_v21 = vpack.c.bf16 %v98_v16, %v98_v16  ;;  %68 = vst [vmem:[#allocation8] sm:$0x3] %v1352_v27  ;;  %v828_v28 = vld [vmem:[#allocation7] sm:$0xff]  ;;  %v835_v39 = vld [vmem:[#allocation7 + $0x38] sm:$0xff]  ;;  %v1002_v16 = vld [vmem:[%s1462_s2] ss:$0 sm:$0xff] }
  0x51   :  { %v832_v35 = vld [vmem:[#allocation7 + $0x20] sm:$0xff]  ;;  %v1156_v40 = vpack.c.bf16 %v835_v39, %v834_v38  ;;  %v843_v51 = vld [vmem:[#allocation7 + $0x78] sm:$0xff] }
  0x52   :  { %1019 = vmatpush3.bf16.msra.mxu0 %v1208_v31  ;;  %v121_v22 = vpack.c.bf16 %v106_v19, %v106_v19  ;;  %v107_v23 = vcombine.high %v105_v20, %v105_v20  ;;  %v122_v25 = vpack.c.bf16 %v105_v20, %v105_v20  ;;  %v1353_v31 = vmov 0.0|0.0  }
  0x53   :  { %1041 = vmatpush3.bf16.msra.mxu1 %v1209_v32  ;;  %1020 = vmatprep.subr.bf16.mxu0 %v1210_v33  ;;  %v1147_v32 = vpack.c.bf16 %v829_v29, %v828_v28  ;;  %v831_v33 = vld [vmem:[#allocation7 + $0x18] sm:$0xff]  ;;  %v1005_v29 = vld [vmem:[%s1465_s5] ss:$0 sm:$0xff] }
  0x54   :  { %1042 = vmatprep.subr.bf16.mxu1 %v1211_v34  ;;  %v123_v26 = vpack.c.bf16 %v107_v23, %v107_v23  ;;  %v1150_v34 = vpack.c.bf16 %v831_v33, %v830_v30 }
  0x56   :  { %1021 = vmatpush3.bf16.msra.mxu0 %v1212_v36  ;;  %v833_v36 = vld [vmem:[#allocation7 + $0x28] sm:$0xff] }
  0x57   :  { %1043 = vmatpush3.bf16.msra.mxu1 %v1213_v37  ;;  %1050 = vmatprep.subr.bf16.mxu0 %v1215_v41  ;;  %v1153_v37 = vpack.c.bf16 %v833_v36, %v832_v35  ;;  %v836_v41 = vld [vmem:[#allocation7 + $0x40] sm:$0xff] }
  0x58   :  { %1072 = vmatprep.subr.bf16.mxu1 %v1216_v42  ;;  %v837_v42 = vld [vmem:[#allocation7 + $0x48] sm:$0xff] }
  0x59   :  { %669 = vmatmul.mubr.bf16.vlgmr.msra.gmra.mrb[0].mxu0 %v116_v45  ;;  %v1159_v43 = vpack.c.bf16 %v837_v42, %v836_v41  ;;  %v839_v45 = vld [vmem:[#allocation7 + $0x58] sm:$0xff] }
  0x5a   :  { %1051 = vmatpush3.bf16.msra.mxu0 %v1217_v48  ;;  %709 = vmatmul.mubr.bf16.vlgmr.msra.gmra.mrb[0].mxu1 %v118_v49  ;;  %v1162_v46 = vpack.c.bf16 %v839_v45, %v838_v44  ;;  %v841_v48 = vld [vmem:[#allocation7 + $0x68] sm:$0xff] }
  0x5b   :  { %1052 = vmatprep.subr.bf16.mxu0 %v1219_v50  ;;  %1073 = vmatpush3.bf16.msra.mxu1 %v1218_v52  ;;  %v1165_v49 = vpack.c.bf16 %v841_v48, %v840_v47  ;;  %v842_v50 = vld [vmem:[#allocation7 + $0x70] sm:$0xff] }
  0x5c   :  { %1074 = vmatprep.subr.bf16.mxu1 %v1220_v53  ;;  %748 = vmatprep.mubr.bf16.mxu0 %v121_v22  ;;  %v1168_v52 = vpack.c.bf16 %v843_v51, %v842_v50  ;;  %v825_v22 = vld [vmem:[%s1463_s3] sm:$0x3] }
  0x5d   :  { %788 = vmatprep.mubr.bf16.mxu1 %v123_v26 }
  0x5e   :  { %1053 = vmatpush3.bf16.msra.mxu0 %v1221_v54 }
  0x5f   :  { %1054 = vmatprep.subr.bf16.mxu0 %v1223_v55  ;;  %1075 = vmatpush3.bf16.msra.mxu1 %v1222_v56 }
  0x60   :  { %1076 = vmatprep.subr.bf16.mxu1 %v1224_v57 }
  0x62   :  { %1055 = vmatpush3.bf16.msra.mxu0 %v1225_v58 }
  0x63   :  { %1056 = vmatprep.subr.bf16.mxu0 %v1227_v59  ;;  %1077 = vmatpush3.bf16.msra.mxu1 %v1226_v60 }
  0x64   :  { %1078 = vmatprep.subr.bf16.mxu1 %v1228_v61 }
  0x66   :  { %1057 = vmatpush3.bf16.msra.mxu0 %v1229_v62 }
  0x67   :  { %1058 = vmatprep.subr.bf16.mxu0 %v1231_v63  ;;  %1079 = vmatpush3.bf16.msra.mxu1 %v1230_v0 }
  0x68   :  { %1080 = vmatprep.subr.bf16.mxu1 %v1232_v1 }
  0x6a   :  { %1059 = vmatpush3.bf16.msra.mxu0 %v1233_v2 }
  0x6b   :  { %1060 = vmatprep.subr.bf16.mxu0 %v1235_v3  ;;  %1081 = vmatpush3.bf16.msra.mxu1 %v1234_v4 }
  0x6c   :  { %1082 = vmatprep.subr.bf16.mxu1 %v1236_v5 }
  0x6e   :  { %1061 = vmatpush3.bf16.msra.mxu0 %v1237_v6 }
  0x6f   :  { %1062 = vmatprep.subr.bf16.mxu0 %v1239_v7  ;;  %1083 = vmatpush3.bf16.msra.mxu1 %v1238_v8  ;;  %v811_v7 = vand.u32 127, %v78_v24 }
  0x70   :  { %1084 = vmatprep.subr.bf16.mxu1 %v1240_v9 }
  0x71   :  { %vm812_vm1 = vcmp.ge.s32.totalorder %v811_v7, 64  ;;  %vm813_vm2 = vcmp.lt.s32.totalorder %v811_v7, 104  ;;  %vm817_vm4 = vcmp.lt.s32.totalorder %v811_v7, 40 }
  0x72   :  { %1063 = vmatpush3.bf16.msra.mxu0 %v1241_v10  ;;  %vm814_vm3 = vmand %vm812_vm1, %vm813_vm2 }
  0x73   :  { %1064 = vmatprep.subr.bf16.mxu0 %v1243_v11  ;;  %1085 = vmatpush3.bf16.msra.mxu1 %v1242_v12  ;;  %v69_v12 = vld [vmem:[#allocation8] sm:$0x3] }
  0x74   :  { %1086 = vmatprep.subr.bf16.mxu1 %v1244_v13 }
  0x76   :  { %1065 = vmatpush3.bf16.msra.mxu0 %v1245_v15  ;;  %v1003_v15 = vsel %vm814_vm3, 1.0, %v1352_v27 }
  0x77   :  { %1087 = vmatpush3.bf16.msra.mxu1 %v1246_v18  ;;  %1146 = vmatprep.subr.bf16.mxu0 %v1353_v31  ;;  %v820_v17 = vmul.f32 0.5, %v1003_v15 }
  0x79   :  { %749 = vmatmul.mubr.bf16.vlgmr.msra.gmra.mrb[4].mxu0 %v120_v21  ;;  %v1004_v21 = vsel %vm817_vm4, 1.0, %v1352_v27 }
  0x7a   :  { %789 = vmatmul.mubr.bf16.vlgmr.msra.gmra.mrb[4].mxu1 %v122_v25  ;;  %1148 = vmatpush3.bf16.msra.mxu0 %v1147_v32 }
  0x7b   :  { %1149 = vmatprep.subr.bf16.mxu0 %v1353_v31  ;;  %1143 = vmatprep.mubr.msk.f32.mxu0 %vm1354_vm0, %v1352_v27 }
  0x7e   :  { %1151 = vmatpush3.bf16.msra.mxu0 %v1150_v34 }
  0x7f   :  { %1152 = vmatprep.subr.bf16.mxu0 %v1353_v31 }
  0x82   :  { %1154 = vmatpush3.bf16.msra.mxu0 %v1153_v37 }
  0x83   :  { %1155 = vmatprep.subr.bf16.mxu0 %v1353_v31 }
  0x86   :  { %1157 = vmatpush3.bf16.msra.mxu0 %v1156_v40 }
  0x87   :  { %1158 = vmatprep.subr.bf16.mxu0 %v1353_v31 }
  0x8a   :  { %1160 = vmatpush3.bf16.msra.mxu0 %v1159_v43 }
  0x8b   :  { %1161 = vmatprep.subr.bf16.mxu0 %v1353_v31 }
  0x8e   :  { %1163 = vmatpush3.bf16.msra.mxu0 %v1162_v46 }
  0x8f   :  { %1164 = vmatprep.subr.bf16.mxu0 %v1353_v31 }
  0x92   :  { %1166 = vmatpush3.bf16.msra.mxu0 %v1165_v49 }
  0x93   :  { %1167 = vmatprep.subr.bf16.mxu0 %v1353_v31 }
  0x96   :  { %1169 = vmatpush3.bf16.msra.mxu0 %v1168_v52 }
 0x12c   :  { %v1022_v53 = vpop.f32.mrb[0].mxu0 }
 0x12d   :  { %v1023_v54 = vpop.f32.mrb[1].mxu0  ;;  %v1044_v55 = vpop.f32.mrb[0].mxu1 }
 0x12e   :  { %v1024_v56 = vadd.f32 %v1023_v54, %v1022_v53  ;;  %v1025_v57 = vpop.f32.mrb[2].mxu0  ;;  %v1045_v58 = vpop.f32.mrb[1].mxu1 }
 0x12f   :  { %v1026_v59 = vpop.f32.mrb[3].mxu0  ;;  %v1046_v60 = vadd.f32 %v1045_v58, %v1044_v55  ;;  %v1047_v61 = vpop.f32.mrb[2].mxu1 }
 0x130   :  { %v1048_v62 = vpop.f32.mrb[3].mxu1 }
 0x131   :  { %v711_v63 = vadd.f32 %v1046_v60, %v1024_v56 }
 0x14c   :  { %v1066_v0 = vpop.f32.mrb[4].mxu0 }
 0x14d   :  { %v1067_v1 = vpop.f32.mrb[5].mxu0  ;;  %v1088_v2 = vpop.f32.mrb[4].mxu1 }
 0x14e   :  { %v1068_v3 = vadd.f32 %v1067_v1, %v1066_v0  ;;  %v1069_v4 = vpop.f32.mrb[6].mxu0  ;;  %v1089_v5 = vpop.f32.mrb[5].mxu1 }
 0x14f   :  { %v1070_v6 = vpop.f32.mrb[7].mxu0  ;;  %v1090_v9 = vadd.f32 %v1089_v5, %v1088_v2  ;;  %v1091_v10 = vpop.f32.mrb[6].mxu1 }
 0x150   :  { %v751_v8 = vadd.f32 %v1068_v3, %v711_v63  ;;  %v1092_v11 = vpop.f32.mrb[7].mxu1 }
 0x152   :  { %v791_v13 = vadd.f32 %v1090_v9, %v751_v8 }
 0x154   :  { %v796_v14 = vadd.f32 %v791_v13, %v69_v12 }
 0x156   :  { %797 = vst [vmem:[#allocation8] sm:$0x3] %v796_v14 }
 0x15d   :  { %v801_v18 = vld [vmem:[#allocation8] sm:$0x3] }
 0x15e   :  { %v809_v24 = vadd.f32 %v1002_v16, %v801_v18 }
 0x160   :  { %v821_v19 = vmul.f32 %v820_v17, %v809_v24  ;;  %v824_v25 = vmul.f32 %v1004_v21, %v809_v24 }
 0x162   :  { %v822_v20 = vmul.f32 1.442695, %v821_v19 }
 0x164   :  { %1248 = vpow2.f32 %v822_v20 }
 0x16e   :  { %v1249_v23 = vpop.eup %1248 }
 0x16f   :  { %v826_v26 = vmul.f32 %v1249_v23, %v825_v22 }
 0x171   :  { %v827_v28 = vadd.f32 %v826_v26, %v824_v25 }
 0x173   :  { %1144 = vmatmul.mubr.f32.vlgmr.msra.gmra.mrb[8].mxu0 %v827_v28 }
 0x246   :  { %v917_v30 = vpop.f32.mrb[8].mxu0 }
 0x247   :  { %v918_v31 = vadd.f32 %v1005_v29, %v917_v30  ;;  %v1145_v32 = vpop.f32.mrb[9].mxu0 }
 0x249   :  { %921 = vst [vmem:[#allocation8] sm:$0x3] %v918_v31 }
 0x24a   :  { %1327 = shalt.err (!%p1324_p0)
}
 0x24b   :  { %s1328_s19 = scalar_lea.hbm %s1466_s6, 32 }
 0x24c   :  { %p1329_p1 = scmp.ne.s32.totalorder %s1466_s6, %s1328_s19  ;;  %p1332_p2 = scmp.lt.u32.totalorder %s1328_s19, %s1466_s6 }
 0x24e   :  { %p1334_p3 = pnand %p1332_p2, %p1329_p1 }
 0x250   :  { %1337 = shalt.err (!%p1334_p3)
}
 0x251   :  { %931 = dma.vmem_to_hbm [thread:$0]  %s929_s16, 32, %s1466_s6, [#allocation4]  }
 0x252   :  { %1342 = dma.done.wait [#allocation4], 32  }
 0x253   :  { %1343 = vsyncadd [#allocation4], 4294967264 }
 0x254   :  { %935 = vsyncpa [#allocation3], 1 }
 0x255   :  { %936 = vsyncpa [#allocation6], 1 }
 0x256   :  { %937 = vsyncpa [#allocation4], 1 }

</bundles_post_ra>
